<compile_context>
chip_gen: v7x
topology: tpu7x:2x2x1
jax: 0.10.0
libtpu: 0.0.40
codegen_flags: <defaults>
</compile_context>

<pallas_src>
import jax
import jax.numpy as jnp
from jax.experimental import pallas as pl
from jax.experimental.pallas import tpu as pltpu


def downsample_kernel(x_ref, w_ref, b_ref, o_ref):
    # x_ref: (1, Kp, T)   bf16 im2col patches for one batch element / spatial tile
    # w_ref: (Cout, Kp)   bf16 conv weights (contraction dim zero-padded)
    # b_ref: (Cout, 1)    f32 conv bias
    # o_ref: (1, Cout, T) output tile, T is the lane (minor) dim
    y = jnp.dot(w_ref[...], x_ref[0], preferred_element_type=jnp.float32)  # MXU, f32 acc
    y = y + b_ref[...]                       # lane-broadcast bias (Cout,1) -> (Cout,T)
    y = jnp.where(y > 0, y, 0.2 * y)         # LeakyReLU(0.2)
    o_ref[0] = y.astype(o_ref.dtype)


def _pick_tile(p):
    """Largest lane-dense tile (multiple of 128) that divides the flattened spatial dim."""
    for t in (4096, 2048, 1024, 512, 256, 128):
        if p % t == 0:
            return t
    return p  # falls back to the full (untiled) axis; allowed since it equals the array dim


def downsample_forward(x, weight, bias, *, compute_dtype=jnp.bfloat16):
    """x: (N, Cin, D, H, W); weight: (Cout, Cin, 3, 3, 3); bias: (Cout,)."""
    N, Cin, D, H, W = x.shape
    Cout = weight.shape[0]
    Do = (D - 1) // 2 + 1
    Ho = (H - 1) // 2 + 1
    Wo = (W - 1) // 2 + 1
    P = Do * Ho * Wo
    K = 27 * Cin
    Kp = ((K + 127) // 128) * 128            # pad contraction dim to a full MXU tile

    # ---- glue: stride-2 im2col oriented (N, K, P) so P is the minor/lane dim ----
    xp = jnp.pad(x, ((0, 0), (0, 0), (1, 1), (1, 1), (1, 1)))
    taps = []
    for kd in range(3):
        for kh in range(3):
            for kw in range(3):
                taps.append(
                    xp[:, :,
                       kd:kd + 2 * Do - 1:2,
                       kh:kh + 2 * Ho - 1:2,
                       kw:kw + 2 * Wo - 1:2])
    patches = jnp.stack(taps, axis=1)                         # (N, 27, Cin, Do, Ho, Wo)
    patches = patches.reshape(N, K, P).astype(compute_dtype)  # bf16 halves input DMA
    patches = jnp.pad(patches, ((0, 0), (0, Kp - K), (0, 0)))

    # weight[co, ci, kd, kh, kw] -> w2[co, (kd*9+kh*3+kw)*Cin + ci]
    w2 = jnp.transpose(weight, (0, 2, 3, 4, 1)).reshape(Cout, K).astype(compute_dtype)
    w2 = jnp.pad(w2, ((0, 0), (0, Kp - K)))
    b2 = bias.reshape(Cout, 1).astype(jnp.float32)

    tile_p = _pick_tile(P)
    grid = (N, P // tile_p)

    out = pl.pallas_call(
        downsample_kernel,
        out_shape=jax.ShapeDtypeStruct((N, Cout, P), x.dtype),
        grid_spec=pltpu.PrefetchScalarGridSpec(
            num_scalar_prefetch=0,
            grid=grid,
            in_specs=[
                pl.BlockSpec((1, Kp, tile_p), lambda n, t: (n, 0, t)),
                pl.BlockSpec((Cout, Kp), lambda n, t: (0, 0)),   # weights stay resident
                pl.BlockSpec((Cout, 1), lambda n, t: (0, 0)),    # bias stays resident
            ],
            out_specs=pl.BlockSpec((1, Cout, tile_p), lambda n, t: (n, 0, t)),
        ),
        compiler_params=pltpu.CompilerParams(
            dimension_semantics=("parallel", "parallel"),
            vmem_limit_bytes=32 * 1024 * 1024,  # safe on v5e/v6e/v7x (64 MiB physical on v7x)
        ),
    )(patches, w2, b2)

    # Kernel output layout reshapes directly to NCDHW — no transpose pass needed.
    return out.reshape(N, Cout, Do, Ho, Wo)


def downsample_reference(x, weight, bias):
    """Pure-JAX f32 reference mirroring the PyTorch DownSample module."""
    y = jax.lax.conv_general_dilated(
        x, weight, window_strides=(2, 2, 2), padding=((1, 1), (1, 1), (1, 1)),
        dimension_numbers=("NCDHW", "OIDHW", "NCDHW"))
    y = y + bias[None, :, None, None, None]
    return jnp.where(y > 0, y, 0.2 * y)        # LeakyReLU(0.2)


if __name__ == "__main__":
    key = jax.random.PRNGKey(0)
    k_x, k_w, k_b = jax.random.split(key, 3)

    N, Cin, Cout = 2, 4, 8
    D = H = W = 16

    x = jax.random.normal(k_x, (N, Cin, D, H, W), dtype=jnp.float32)
    # Deterministic synthetic Conv3d(in=4, out=8, k=3) parameters.
    fan_in = Cin * 27
    bound = 1.0 / (fan_in ** 0.5)
    weight = jax.random.uniform(k_w, (Cout, Cin, 3, 3, 3), jnp.float32, -bound, bound)
    bias = jax.random.uniform(k_b, (Cout,), jnp.float32, -bound, bound)

    out = jax.block_until_ready(downsample_forward(x, weight, bias))
    ref = jax.block_until_ready(downsample_reference(x, weight, bias))

    assert out.shape == (N, Cout, D // 2, H // 2, W // 2), out.shape
    max_err = float(jnp.max(jnp.abs(out - ref)))
    # bf16 MXU inputs with f32 accumulation vs. a pure-f32 reference.
    assert jnp.allclose(out, ref, atol=3e-2, rtol=3e-2), max_err

    print("KERNEL_OK")
</pallas_src>

<mosaic_0001>
module attributes {stable_mosaic.version = 11 : i64} {
  func.func @downsample_kernel(%arg0: i32, %arg1: i32, %arg2: memref<1x128x512xbf16, #tpu.memory_space<vmem>>, %arg3: memref<8x128xbf16, #tpu.memory_space<vmem>>, %arg4: memref<8x1xf32, #tpu.memory_space<vmem>>, %arg5: memref<1x8x512xf32, #tpu.memory_space<vmem>>) attributes {dimension_semantics = [#tpu.dimension_semantics<parallel>, #tpu.dimension_semantics<parallel>], iteration_bounds = array<i64: 2, 1>, scalar_prefetch = 0 : i64, scratch_operands = 0 : i64, tpu.core_type = #tpu.core_type<tc>, window_params = [{transform_indices = @transform_0, window_bounds = array<i64: 1, 128, 512>}, {pipeline_mode = #tpu.pipeline_mode<synchronous>, transform_indices = @transform_1, window_bounds = array<i64: 8, 128>}, {pipeline_mode = #tpu.pipeline_mode<synchronous>, transform_indices = @transform_2, window_bounds = array<i64: 8, 1>}, {transform_indices = @transform_3, window_bounds = array<i64: 1, 8, 512>}]} {
    %c0 = arith.constant 0 : index
    %c0_0 = arith.constant 0 : index
    %0 = vector.load %arg3[%c0, %c0_0] : memref<8x128xbf16, #tpu.memory_space<vmem>>, vector<8x128xbf16>
    %c0_1 = arith.constant 0 : index
    %c0_2 = arith.constant 0 : index
    %c0_3 = arith.constant 0 : index
    %1 = vector.load %arg2[%c0_1, %c0_2, %c0_3] : memref<1x128x512xbf16, #tpu.memory_space<vmem>>, vector<1x128x512xbf16>
    %2 = vector.shape_cast %1 : vector<1x128x512xbf16> to vector<128x512xbf16>
    %cst = arith.constant dense<0.000000e+00> : vector<8x512xf32>
    %3 = tpu.matmul %0, %2, %cst {dimension_numbers = #tpu.dot_dimension_numbers<[1], [0], [0], [1], [0, 0, 1, 1], [], []>} : vector<8x128xbf16>, vector<128x512xbf16>, vector<8x512xf32> -> vector<8x512xf32>
    %c0_4 = arith.constant 0 : index
    %c0_5 = arith.constant 0 : index
    %4 = vector.load %arg4[%c0_4, %c0_5] : memref<8x1xf32, #tpu.memory_space<vmem>>, vector<8x1xf32>
    %5 = vector.broadcast %4 : vector<8x1xf32> to vector<8x512xf32>
    %6 = arith.addf %3, %5 : vector<8x512xf32>
    %cst_6 = arith.constant 0.000000e+00 : f32
    %7 = vector.broadcast %cst_6 : f32 to vector<8x512xf32>
    %8 = arith.cmpf ogt, %6, %7 : vector<8x512xf32>
    %cst_7 = arith.constant 2.000000e-01 : f32
    %9 = vector.broadcast %cst_7 : f32 to vector<8x512xf32>
    %10 = arith.mulf %9, %6 : vector<8x512xf32>
    %11 = arith.select %8, %6, %10 : vector<8x512xi1>, vector<8x512xf32>
    %c0_8 = arith.constant 0 : index
    %c0_9 = arith.constant 0 : index
    %c0_10 = arith.constant 0 : index
    %12 = vector.load %arg5[%c0_8, %c0_9, %c0_10] : memref<1x8x512xf32, #tpu.memory_space<vmem>>, vector<1x8x512xf32>
    %13 = vector.shape_cast %12 : vector<1x8x512xf32> to vector<8x512xf32>
    %14 = vector.shape_cast %11 : vector<8x512xf32> to vector<1x8x512xf32>
    tpu.vector_store %arg5[%c0_8, %c0_9, %c0_10], %14 {strides = array<i32>} : memref<1x8x512xf32, #tpu.memory_space<vmem>>, vector<1x8x512xf32>,
    return
  }
  func.func @transform_0(%arg0: i32, %arg1: i32) -> (i32, i32, i32) {
    %c0_i32 = arith.constant 0 : i32
    %c0_i32_0 = arith.constant 0 : i32
    return %arg0, %c0_i32, %arg1 : i32, i32, i32
  }
  func.func @transform_1(%arg0: i32, %arg1: i32) -> (i32, i32) {
    %c0_i32 = arith.constant 0 : i32
    %c0_i32_0 = arith.constant 0 : i32
    %c0_i32_1 = arith.constant 0 : i32
    return %c0_i32, %c0_i32_0 : i32, i32
  }
  func.func @transform_2(%arg0: i32, %arg1: i32) -> (i32, i32) {
    %c0_i32 = arith.constant 0 : i32
    %c0_i32_0 = arith.constant 0 : i32
    %c0_i32_1 = arith.constant 0 : i32
    return %c0_i32, %c0_i32_0 : i32, i32
  }
  func.func @transform_3(%arg0: i32, %arg1: i32) -> (i32, i32, i32) {
    %c0_i32 = arith.constant 0 : i32
    %c0_i32_0 = arith.constant 0 : i32
    return %arg0, %c0_i32, %arg1 : i32, i32, i32
  }
}

</mosaic_0001>

<bundles_post_ra>
// kernel: tpu_custom_call.1
= control target key start
LH: loop header
LB: loop body
LE: loop exit
PB: predicated region body
PF: predicated region fallthrough
CT: control target
= control target key end

     0   :  { %8 = vsyncpa [#allocation3], 0  ;;  %s1124_s0 = inlined_call_operand.hbm [shape: bf16[2,128,512], index: 0, kind: input, shape index: {}]   ;;  %s1125_s1 = inlined_call_operand.vmem [shape: bf16[8,128], index: 1, kind: input, shape index: {}]   ;;  %s1126_s2 = inlined_call_operand.vmem [shape: f32[8,1], index: 2, kind: input, shape index: {}]   ;;  %s1127_s3 = inlined_call_operand.hbm [shape: f32[2,8,512], index: 3, kind: output, shape index: {}]  }
   0x1   :  { %10 = vsyncpa [#allocation3 + $0x1], 0 }
   0x2   :  { %11 = vsyncpa [#allocation4], 0 }
   0x3   :  { %13 = vsyncpa [#allocation4 + $0x1], 0  ;;  %s910_s12 = smov 0   ;;  %s912_s13 = smov 0  }
   0x4   :  { %s914_s14 = smov 0   ;;  %s916_s15 = smov 0  }
   0x5   :  { %s918_s16 = smov 0   ;;  %s920_s17 = smov 0  }
   0x6 LB: > { %s608_s18 = sadd.s32 4294967295, %s883_s17   ;;  %s609_s19 = sadd.s32 4294967294, %s883_s17   ;;  %s883_s17 = sphi %s920_s17, %s19_s17   ;;  %s879_s16 = sphi %s918_s16, %s1142_s16   ;;  %s875_s15 = sphi %s916_s15, %s1141_s15   ;;  %s871_s14 = sphi %s914_s14, %s1140_s14   ;;  %s867_s13 = sphi %s912_s13, %s1139_s13   ;;  %s863_s12 = sphi %s910_s12, %s1138_s12  }
   0x7   : > { %s31_s20 = sadd.s32 1, %s879_s16  ;;  %s40_s21 = sadd.s32 1, %s871_s14 }
   0x8   : > { %p33_p0 = scmp.ge.s32.totalorder %s31_s20, 2  ;;  %p47_p1 = scmp.ne.s32.totalorder %s871_s14, %s867_s13 }
   0x9   : > { %p48_p2 = scmp.eq.s32.totalorder %s883_s17, 0  ;;  %p53_p3 = scmp.ne.s32.totalorder %s867_s13, %s863_s12 }
   0xa   : > { %s1144_s20 = smov (%p33_p0, %s31_s20), 0  ;;  %p54_p5 = scmp.eq.s32.totalorder %s608_s18, 0 }
   0xb   : > { %p951_p4 = por %p48_p2, %p47_p1  ;;  %s35_s23 = ssub.s32 %s879_s16, %s1144_s20 }
   0xc   : > { %p121_p6 = scmp.eq.s32.totalorder %s608_s18, 1  ;;  %p38_p7 = scmp.eq.s32.totalorder %s35_s23, 0 }
   0xd   : > { %p957_p8 = por %p54_p5, %p53_p3  ;;  %p127_p10 = scmp.eq.s32.totalorder %s609_s19, 1 }
   0xe   : > { %p961_p9 = por %p121_p6, %p47_p1  ;;  %p669_p13 = scmp.lt.s32.totalorder %s883_s17, 2 }
   0xf   : > { %s966_s26 = scalar_select %p38_p7, %s871_s14, %s40_s21  }
  0x10   : > { %s1131_s25 = scalar_select %p961_p9, 1, 0 }
  0x11   : > { %p968_p11 = por %p127_p10, %p53_p3  ;;  %s153_s28 = sand.u32 1, %s871_s14  }
  0x12   : > { %s612_s29 = sshll.u32 %s153_s28, 8  ;;  %s655_s30 = sshll.u32 %s879_s16, 12 }
  0x13   : > { %s1132_s27 = scalar_select %p968_p11, 1, 0 }
  0x14   : > { %s979_s6 = scalar_lea.hbm %s1124_s0, %s655_s30  ;;  %s157_s7 = scalar_lea.vmem [#allocation2], %s612_s29 }
  0x15   : > { %s166_s8 = sshll.u32 %s157_s7, 4  ;;  %p985_p0 = pnand %p669_p13, %p951_p4  ;;  %s981_s8 = int_to_ptr.vmem [resolvable:$true] %s166_s8 }
  0x16   : > { %s990_s10 = scalar_lea.sflag [#allocation3], %s153_s28  ;;  %s771_s11 = scalar_lea.hbm %s979_s6, 4096 }
  0x17   : > { %p772_p2 = scmp.ne.s32.totalorder %s979_s6, %s771_s11  ;;  %p773_p3 = pneg %p985_p0 }
  0x18   : > { %s776_s21 = scalar_lea.hbm %s1124_s0, 8192  ;;  %p777_p4 = scmp.lt.u32.totalorder %s979_s6, %s1124_s0 }
  0x19   : > { %p774_p5 = pnand %p773_p3, %p772_p2  ;;  %p778_p7 = scmp.lt.u32.totalorder %s776_s21, %s771_s11 }
  0x1a   : > { %p780_p13 = scmp.lt.u32.totalorder %s771_s11, %s979_s6 }
  0x1b   : > { %p775_p6 = pneg %p774_p5  ;;  %p779_p10 = por %p778_p7, %p777_p4 }
  0x1d   : > { %p781_p12 = por %p780_p13, %p779_p10 }
  0x1f   : > { %p782_p1 = pnand %p781_p12, %p775_p6 }
  0x21   : > { %785 = shalt.err (!%p782_p1)
}
  0x22   : > { %s786_s28 = scalar_lea.vmem %s981_s8, 4096  ;;  %s885_s29 = smov [#allocation2]  }
  0x23   : > { %p787_p2 = scmp.ne.s32.totalorder %s981_s8, %s786_s28  ;;  %s791_s30 = sshll.u32 %s885_s29, 4  ;;  %s792_s30 = int_to_ptr.vmem [resolvable:$false] %s791_s30 }
  0x24   : > { %s793_s4 = scalar_lea.vmem %s792_s30, 8192  ;;  %p794_p9 = scmp.lt.s32.totalorder %s981_s8, %s792_s30 }
  0x25   : > { %p789_p5 = pnand %p787_p2, %p773_p3  ;;  %p795_p4 = scmp.lt.s32.totalorder %s793_s4, %s786_s28 }
  0x27   : > { %p790_p11 = pneg %p789_p5  ;;  %p796_p7 = por %p795_p4, %p794_p9 }
  0x29   : > { %p797_p10 = pnand %p796_p7, %p790_p11 }
  0x2b   : > { %800 = shalt.err (!%p797_p10)
}
  0x2c   : > { %s886_s5 = smov 256   ;;  %s887_s7 = smov 16  }
  0x2d   : > { %664 = dma.hbm_to_vmem [thread:$0]  (!%p985_p0), %s979_s6, 4096, %s981_s8, %s990_s10, %s886_s5, %s886_s5, %s887_s7  }
  0x2e   : > { %p174_p12 = scmp.lt.s32.totalorder %s883_s17, 3  ;;  %p1134_p1 = scmp.ge.s32.totalorder %s883_s17, 1 }
  0x30   : > { %p175_p3 = pnand %p1134_p1, %p174_p12 }
  0x31   : > { %s1022_s11 = sand.u32 (!%p175_p3), 1, %s867_s13  }
  0x32   : > { %178 = sbr.rel (%p175_p3) target bundleno = 325 (0x145), region = 32  ;;  %s616_s18 = sshll.u32 (!%p175_p3), %s1022_s11, 8 }
  0x33   : > { %s181_s19 = scalar_lea.sflag (!%p175_p3), [#allocation3], %s1022_s11  ;;  %s1026_s21 = scalar_lea.vmem (!%p175_p3), [#allocation2], %s616_s18 }
  0x39   : > { %854 = dma.done.wait (%p957_p8), %s181_s19, 4096  }
  0x3a   : > { %856 = vsyncadd (%p957_p8), %s181_s19, 4294963200  ;;  %v888_v0 = vmov 0   ;;  %v723_v1 = vld [vmem:[%s1026_s21 + $0x4] ss:$16 sps:$4 sm:$0xff]   ;;  %v725_v2 = vld [vmem:[%s1026_s21 + $0xc] ss:$16 sps:$4 sm:$0xff]  }
  0x3b   : > { %441 = vmatprep.mubr.bf16.mxu0 %v888_v0  ;;  %482 = vmatprep.mubr.bf16.mxu1 %v888_v0  ;;  %v727_v3 = vld [vmem:[%s1026_s21] ss:$16 sps:$4 sm:$0xff]   ;;  %v728_v4 = vld [vmem:[%s1026_s21 + $0x8] ss:$16 sps:$4 sm:$0xff]   ;;  %v729_v5 = vld [vmem:[%s1026_s21 + $0x24] ss:$16 sps:$4 sm:$0xff]  }
  0x3c   : > { %722 = vset.pattern.permute.xlu0 %v888_v0  ;;  %409 = vmatprep.subr.bf16.mxu0 %v723_v1  ;;  %v731_v6 = vld [vmem:[%s1026_s21 + $0x2c] ss:$16 sps:$4 sm:$0xff]   ;;  %v733_v7 = vld [vmem:[%s1026_s21 + $0x20] ss:$16 sps:$4 sm:$0xff]   ;;  %v734_v8 = vld [vmem:[%s1026_s21 + $0x28] ss:$16 sps:$4 sm:$0xff]  }
  0x3d   : > { %450 = vmatprep.subr.bf16.mxu1 %v725_v2  ;;  %410 = vmatpush1.bf16.msra.mxu0 %v727_v3  ;;  %v735_v9 = vld [vmem:[%s1026_s21 + $0x44] ss:$16 sps:$4 sm:$0xff]   ;;  %v737_v10 = vld [vmem:[%s1026_s21 + $0x4c] ss:$16 sps:$4 sm:$0xff]   ;;  %v739_v11 = vld [vmem:[%s1026_s21 + $0x40] ss:$16 sps:$4 sm:$0xff]  }
  0x3e   : > { %451 = vmatpush1.bf16.msra.mxu1 %v728_v4  ;;  %411 = vmatprep.subr.bf16.mxu0 %v729_v5  ;;  %v740_v12 = vld [vmem:[%s1026_s21 + $0x48] ss:$16 sps:$4 sm:$0xff]   ;;  %v741_v13 = vld [vmem:[%s1026_s21 + $0x64] ss:$16 sps:$4 sm:$0xff]   ;;  %v743_v14 = vld [vmem:[%s1026_s21 + $0x6c] ss:$16 sps:$4 sm:$0xff]  }
  0x3f   : > { %452 = vmatprep.subr.bf16.mxu1 %v731_v6  ;;  %v745_v15 = vld [vmem:[%s1026_s21 + $0x60] ss:$16 sps:$4 sm:$0xff]   ;;  %v746_v16 = vld [vmem:[%s1026_s21 + $0x68] ss:$16 sps:$4 sm:$0xff]   ;;  %v747_v17 = vld [vmem:[%s1026_s21 + $0x84] ss:$16 sps:$4 sm:$0xff]  }
  0x40   : > { %v749_v18 = vld [vmem:[%s1026_s21 + $0x8c] ss:$16 sps:$4 sm:$0xff]   ;;  %v751_v19 = vld [vmem:[%s1026_s21 + $0x80] ss:$16 sps:$4 sm:$0xff]   ;;  %v752_v20 = vld [vmem:[%s1026_s21 + $0x88] ss:$16 sps:$4 sm:$0xff]  }
  0x41   : > { %412 = vmatpush1.bf16.msra.mxu0 %v733_v7  ;;  %v753_v21 = vld [vmem:[%s1026_s21 + $0xa4] ss:$16 sps:$4 sm:$0xff]   ;;  %v755_v22 = vld [vmem:[%s1026_s21 + $0xac] ss:$16 sps:$4 sm:$0xff]   ;;  %v757_v23 = vld [vmem:[%s1026_s21 + $0xa0] ss:$16 sps:$4 sm:$0xff]  }
  0x42   : > { %453 = vmatpush1.bf16.msra.mxu1 %v734_v8  ;;  %413 = vmatprep.subr.bf16.mxu0 %v735_v9  ;;  %v758_v24 = vld [vmem:[%s1026_s21 + $0xa8] ss:$16 sps:$4 sm:$0xff]   ;;  %v759_v25 = vld [vmem:[%s1026_s21 + $0xc4] ss:$16 sps:$4 sm:$0xff]   ;;  %v761_v26 = vld [vmem:[%s1026_s21 + $0xcc] ss:$16 sps:$4 sm:$0xff]  }
  0x43   : > { %454 = vmatprep.subr.bf16.mxu1 %v737_v10  ;;  %v243_v27 = vld [vmem:[%s1126_s2] sm:$0xff]  ;;  %v764_v29 = vld [vmem:[%s1026_s21 + $0xc8] ss:$16 sps:$4 sm:$0xff]   ;;  %v767_v31 = vld [vmem:[%s1026_s21 + $0xec] ss:$16 sps:$4 sm:$0xff]   ;;  %s617_s10 = sshll.u32 %s1022_s11, 5 }
  0x44   : > { %246 = vperm.xlu0 %722, %v243_v27   ;;  %v763_v28 = vld [vmem:[%s1026_s21 + $0xc0] ss:$16 sps:$4 sm:$0xff]   ;;  %v765_v30 = vld [vmem:[%s1026_s21 + $0xe4] ss:$16 sps:$4 sm:$0xff]   ;;  %v770_v33 = vld [vmem:[%s1026_s21 + $0xe8] ss:$16 sps:$4 sm:$0xff]  }
  0x45   : > { %414 = vmatpush1.bf16.msra.mxu0 %v739_v11  ;;  %v769_v32 = vld [vmem:[%s1026_s21 + $0xe0] ss:$16 sps:$4 sm:$0xff]   ;;  %s656_s22 = sshll.u32 %s875_s15, 9  ;;  %s206_s23 = scalar_lea.vmem [#allocation5], %s617_s10 }
  0x46   : > { %455 = vmatpush1.bf16.msra.mxu1 %v740_v12  ;;  %415 = vmatprep.subr.bf16.mxu0 %v741_v13  ;;  %v210_v34 = vld [vmem:[%s1125_s1] sm:$0xf]  ;;  %s524_s28 = sshll.u32 %s206_s23, 4  ;;  %s1075_s15 = scalar_lea.hbm %s1127_s3, %s656_s22  ;;  %s1077_s28 = int_to_ptr.vmem [resolvable:$true] %s524_s28 }
  0x47   : > { %456 = vmatprep.subr.bf16.mxu1 %v743_v14  ;;  %s508_s4 = scalar_lea.sflag [#allocation4], %s1022_s11  ;;  %s801_s5 = scalar_lea.vmem %s1077_s28, 512 }
  0x48   : > { %p802_p8 = scmp.ne.s32.totalorder %s1077_s28, %s801_s5  ;;  %p1135_p9 = scmp.ne.s32.totalorder %s1131_s25, 0 }
  0x49   : > { %416 = vmatpush1.bf16.msra.mxu0 %v745_v15  ;;  %s889_s7 = smov [#allocation5]  }
  0x4a   : > { %457 = vmatpush1.bf16.msra.mxu1 %v746_v16  ;;  %417 = vmatprep.subr.bf16.mxu0 %v747_v17  ;;  %p803_p11 = pnand %p802_p8, %p1135_p9  ;;  %s805_s18 = sshll.u32 %s889_s7, 4  ;;  %s806_s18 = int_to_ptr.vmem [resolvable:$false] %s805_s18 }
  0x4b   : > { %458 = vmatprep.subr.bf16.mxu1 %v749_v18  ;;  %s807_s19 = scalar_lea.vmem %s806_s18, 1024  ;;  %p808_p6 = scmp.lt.s32.totalorder %s1077_s28, %s806_s18 }
  0x4c   : > { %p804_p0 = pneg %p803_p11  ;;  %p809_p13 = scmp.lt.s32.totalorder %s807_s19, %s801_s5 }
  0x4d   : > { %418 = vmatpush1.bf16.msra.mxu0 %v751_v19 }
  0x4e   : > { %459 = vmatpush1.bf16.msra.mxu1 %v752_v20  ;;  %419 = vmatprep.subr.bf16.mxu0 %v753_v21  ;;  %p810_p2 = por %p809_p13, %p808_p6 }
  0x4f   : > { %460 = vmatprep.subr.bf16.mxu1 %v755_v22 }
  0x50   : > { %p811_p5 = pnand %p810_p2, %p804_p0 }
  0x51   : > { %420 = vmatpush1.bf16.msra.mxu0 %v757_v23 }
  0x52   : > { %461 = vmatpush1.bf16.msra.mxu1 %v758_v24  ;;  %421 = vmatprep.subr.bf16.mxu0 %v759_v25 }
  0x53   : > { %462 = vmatprep.subr.bf16.mxu1 %v761_v26 }
  0x55   : > { %422 = vmatpush1.bf16.msra.mxu0 %v763_v28 }
  0x56   : > { %463 = vmatpush1.bf16.msra.mxu1 %v764_v29  ;;  %423 = vmatprep.subr.bf16.mxu0 %v765_v30 }
  0x57   : > { %464 = vmatprep.subr.bf16.mxu1 %v767_v31 }
  0x59   : > { %424 = vmatpush1.bf16.msra.mxu0 %v769_v32 }
  0x5a   : > { %465 = vmatpush1.bf16.msra.mxu1 %v770_v33 }
  0x5c   : > { %442 = vmatmul.mubr.bf16.vlgmr.msra.gmra.mrb[0].mxu0 %v210_v34 }
  0x5d   : > { %483 = vmatmul.mubr.bf16.vlgmr.msra.gmra.mrb[0].mxu1 %v210_v34 }
  0xc3   : > { %v247_v35 = vpop.permute.xlu0 %246 }
 0x12f   : > { %v443_v36 = vpop.f32.mrb[0].mxu0 }
 0x130   : > { %v484_v37 = vpop.f32.mrb[0].mxu1  ;;  %v444_v38 = vadd.f32 %v443_v36, %v247_v35  ;;  %v445_v40 = vpop.f32.mrb[1].mxu0 }
 0x131   : > { %v485_v39 = vadd.f32 %v484_v37, %v247_v35  ;;  %v486_v41 = vpop.f32.mrb[1].mxu1  ;;  %v446_v42 = vadd.f32 %v445_v40, %v247_v35  ;;  %v447_v44 = vpop.f32.mrb[2].mxu0 }
 0x132   : > { %v487_v43 = vadd.f32 %v486_v41, %v247_v35  ;;  %v488_v45 = vpop.f32.mrb[2].mxu1  ;;  %vm491_vm0 = vcmp.gt.f32.partialorder %v444_v38, 0.0  ;;  %v495_v46 = vmul.f32 0.2, %v444_v38  ;;  %v448_v52 = vpop.f32.mrb[3].mxu0 }
 0x133   : > { %vm493_vm1 = vcmp.gt.f32.partialorder %v485_v39, 0.0  ;;  %v497_v47 = vmul.f32 0.2, %v485_v39  ;;  %vm492_vm2 = vcmp.gt.f32.partialorder %v446_v42, 0.0  ;;  %v496_v48 = vmul.f32 0.2, %v446_v42 }
 0x134   : > { %vm494_vm3 = vcmp.gt.f32.partialorder %v487_v43, 0.0  ;;  %v498_v49 = vmul.f32 0.2, %v487_v43  ;;  %v499_v50 = vsel %vm491_vm0, %v444_v38, %v495_v46  ;;  %v489_v53 = vpop.f32.mrb[3].mxu1 }
 0x135   : > { %v501_v51 = vsel %vm493_vm1, %v485_v39, %v497_v47  ;;  %503 = vst [vmem:[%s206_s23] sm:$0xff] %v499_v50  ;;  %v500_v54 = vsel %vm492_vm2, %v446_v42, %v496_v48 }
 0x136   : > { %505 = vst [vmem:[%s206_s23 + $0x10] sm:$0xff] %v501_v51  ;;  %v502_v55 = vsel %vm494_vm3, %v487_v43, %v498_v49  ;;  %504 = vst [vmem:[%s206_s23 + $0x8] sm:$0xff] %v500_v54 }
 0x137   : > { %506 = vst [vmem:[%s206_s23 + $0x18] sm:$0xff] %v502_v55 }
 0x138   : > { %814 = shalt.err (!%p811_p5)
}
 0x139   : > { %s815_s11 = scalar_lea.hbm %s1075_s15, 512  ;;  %s819_s6 = scalar_lea.hbm %s1127_s3, 1024 }
 0x13a   : > { %p816_p4 = scmp.ne.s32.totalorder %s1075_s15, %s815_s11  ;;  %p820_p12 = scmp.lt.u32.totalorder %s1075_s15, %s1127_s3 }
 0x13b   : > { %p821_p1 = scmp.lt.u32.totalorder %s819_s6, %s815_s11  ;;  %p823_p8 = scmp.lt.u32.totalorder %s815_s11, %s1075_s15 }
 0x13c   : > { %p817_p7 = pnand %p816_p4, %p1135_p9 }
 0x13d   : > { %p822_p3 = por %p821_p1, %p820_p12 }
 0x13e   : > { %p818_p10 = pneg %p817_p7 }
 0x13f   : > { %p824_p11 = por %p823_p8, %p822_p3 }
 0x141   : > { %p825_p0 = pnand %p824_p11, %p818_p10 }
 0x143   : > { %828 = shalt.err (!%p825_p0)
}
 0x144   : > { %659 = dma.vmem_to_hbm [thread:$0]  (%p1135_p9), %s1077_s28, 512, %s1075_s15, %s508_s4  }
 0x145 PF: > { %s536_s10 = sand.u32 1, %s863_s12   ;;  %p1136_p6 = scmp.ne.s32.totalorder %s1132_s27, 0 }
 0x146   : > { %p1137_p13 = scmp.ge.s32.totalorder %s883_s17, 2  ;;  %s537_s22 = scalar_lea.sflag [#allocation4], %s536_s10 }
 0x148   : > { %p666_p2 = pnand %p1137_p13, %p1136_p6 }
 0x14a   : > { %858 = dma.done.wait (!%p666_p2), %s537_s22, 512  }
 0x14b   : > { %860 = vsyncadd (!%p666_p2), %s537_s22, 4294966784  ;;  %s19_s17 = sadd.s32 1, %s883_s17   ;;  %s1138_s12 = smov %s867_s13 }
 0x14c   : > { %p16_p5 = scmp.ge.s32.totalorder %s19_s17, 4   ;;  %s1139_s13 = smov %s871_s14 }
 0x14d   : > { %s1140_s14 = smov %s966_s26  ;;  %s1141_s15 = smov %s879_s16 }
 0x14e   : > { %s1142_s16 = smov %s1144_s20  ;;  %18 = sbr.rel (!%p16_p5) target bundleno = 6 (0x6), region = 77 }
 0x155   :  { %542 = vsyncpa [#allocation3], 1 }
 0x156   :  { %544 = vsyncpa [#allocation3 + $0x1], 1 }
 0x157   :  { %545 = vsyncpa [#allocation4], 1 }
 0x158   :  { %547 = vsyncpa [#allocation4 + $0x1], 1 }

</bundles_post_ra>
